<compile_context>
chip_gen: v5e
topology: v5e:2x2
jax: 0.10.0
libtpu: 0.0.40
codegen_flags: <defaults>
</compile_context>

<pallas_src>
import jax
import jax.numpy as jnp
from jax import lax
from jax.experimental import pallas as pl
from jax.experimental.pallas import tpu as pltpu


def _round_up(x, m):
    return ((x + m - 1) // m) * m


def mlp_kernel(x_ref, w1_ref, b1_ref, w2_ref, b2_ref, o_ref, acc_ref):
    # x_ref : (tm, C)   activation row tile
    # w1_ref: (th, C)   row block of c_fc weight  (PyTorch (out, in) layout)
    # b1_ref: (1, th)   matching slice of c_fc bias
    # w2_ref: (C, th)   column block of c_proj weight (PyTorch (out, in) layout)
    # b2_ref: (1, C)    c_proj bias
    # o_ref : (tm, C)   output row tile
    # acc_ref: (tm, C) f32 accumulator, resident across the hidden grid axis
    hk = pl.program_id(1)

    @pl.when(hk == 0)
    def _():
        acc_ref[...] = jnp.zeros_like(acc_ref)

    x = x_ref[...]
    # Hidden chunk: (tm, C) . (th, C)^T -> (tm, th); contraction over the last
    # dims of both operands keeps the weights untransposed in HBM.
    h = lax.dot_general(
        x, w1_ref[...],
        dimension_numbers=(((1,), (1,)), ((), ())),
        preferred_element_type=jnp.float32,
    ) + b1_ref[...]

    # No nonlinearity in this MLP (spec has two back-to-back Linears).
    acc_ref[...] += lax.dot_general(
        h.astype(x.dtype), w2_ref[...],
        dimension_numbers=(((1,), (1,)), ((), ())),
        preferred_element_type=jnp.float32,
    )

    @pl.when(hk == pl.num_programs(1) - 1)
    def _():
        o_ref[...] = (acc_ref[...] + b2_ref[...]).astype(o_ref.dtype)


def mlp_forward(x, w1, b1, w2, b2, *, tm=256, th=512):
    """x: (B, T, C). Weights in PyTorch nn.Linear (out_features, in_features)
    layout: w1 (4C, C), b1 (4C,), w2 (C, 4C), b2 (C,). No transposes here."""
    B, T, C = x.shape
    H, C_in = w1.shape
    assert C_in == C and w2.shape == (C, H)
    M = B * T

    # Row tile: big for MXU utilization, capped to the (padded) problem size.
    tm = max(16, min(tm, _round_up(M, 16)))
    Mp = _round_up(M, tm)

    # Hidden tile: bounds weight VMEM (2 * th * C * itemsize per operand with
    # double-buffering) instead of holding the full 4C weights resident.
    th = min(th, H)
    if H % th != 0:
        th = H  # fallback for small / odd hidden sizes (fits comfortably)

    x2d = x.reshape(M, C)
    if Mp != M:
        x2d = jnp.pad(x2d, ((0, Mp - M), (0, 0)))

    b1_2d = b1.reshape(1, H)
    b2_2d = b2.reshape(1, C)

    itemsize = jnp.dtype(x.dtype).itemsize
    cost = pl.CostEstimate(
        flops=4 * M * C * H,  # two matmuls, 2*M*C*H FLOPs each
        transcendentals=0,
        bytes_accessed=itemsize * (2 * M * C + 2 * H * C + H + C),
    )

    grid = (Mp // tm, H // th)

    out = pl.pallas_call(
        mlp_kernel,
        out_shape=jax.ShapeDtypeStruct((Mp, C), x.dtype),
        grid_spec=pltpu.PrefetchScalarGridSpec(
            num_scalar_prefetch=0,
            grid=grid,
            in_specs=[
                pl.BlockSpec((tm, C), lambda i, hk: (i, 0)),   # x row tile
                pl.BlockSpec((th, C), lambda i, hk: (hk, 0)),  # W1 row block
                pl.BlockSpec((1, th), lambda i, hk: (0, hk)),  # b1 slice
                pl.BlockSpec((C, th), lambda i, hk: (0, hk)),  # W2 col block
                pl.BlockSpec((1, C), lambda i, hk: (0, 0)),    # b2
            ],
            out_specs=pl.BlockSpec((tm, C), lambda i, hk: (i, 0)),
            scratch_shapes=[pltpu.VMEM((tm, C), jnp.float32)],
        ),
        compiler_params=pltpu.CompilerParams(
            dimension_semantics=("parallel", "arbitrary")),
        cost_estimate=cost,
    )(x2d, w1, b1_2d, w2, b2_2d)

    if Mp != M:
        out = out[:M]
    return out.reshape(B, T, C)


if __name__ == "__main__":
    # GPTConfig defaults: n_embd=128, bias=True
    n_embd = 128
    hidden = 4 * n_embd
    B, T = 2, 8

    key = jax.random.PRNGKey(0)
    kx, k1, k2, k3, k4 = jax.random.split(key, 5)

    x = jax.random.normal(kx, (B, T, n_embd), dtype=jnp.float32)
    # Deterministic synthetic params in PyTorch nn.Linear layout (out, in).
    w1 = jax.random.normal(k1, (hidden, n_embd), dtype=jnp.float32) * 0.02
    b1 = jax.random.normal(k2, (hidden,), dtype=jnp.float32) * 0.02
    w2 = jax.random.normal(k3, (n_embd, hidden), dtype=jnp.float32) * 0.02
    b2 = jax.random.normal(k4, (n_embd,), dtype=jnp.float32) * 0.02

    y = mlp_forward(x, w1, b1, w2, b2)
    y = jax.block_until_ready(y)

    # Reference (plain JAX, mirrors torch semantics: x @ W.T + b twice).
    ref = (x @ w1.T + b1) @ w2.T + b2
    assert y.shape == (B, T, n_embd)
    assert jnp.allclose(y, ref, atol=1e-4, rtol=1e-4), "mismatch vs reference"

    print("KERNEL_OK")
</pallas_src>

<mosaic_0001>
module attributes {stable_mosaic.version = 11 : i64} {
  func.func @mlp_kernel(%arg0: i32, %arg1: i32, %arg2: memref<16x128xf32, #tpu.memory_space<vmem>>, %arg3: memref<512x128xf32, #tpu.memory_space<vmem>>, %arg4: memref<1x512xf32, #tpu.memory_space<vmem>>, %arg5: memref<128x512xf32, #tpu.memory_space<vmem>>, %arg6: memref<1x128xf32, #tpu.memory_space<vmem>>, %arg7: memref<16x128xf32, #tpu.memory_space<vmem>>, %arg8: memref<16x128xf32, #tpu.memory_space<vmem>>) attributes {dimension_semantics = [#tpu.dimension_semantics<parallel>, #tpu.dimension_semantics<arbitrary>], iteration_bounds = array<i64: 1, 1>, scalar_prefetch = 0 : i64, scratch_operands = 1 : i64, tpu.core_type = #tpu.core_type<tc>, window_params = [{transform_indices = @transform_0, window_bounds = array<i64: 16, 128>}, {transform_indices = @transform_1, window_bounds = array<i64: 512, 128>}, {transform_indices = @transform_2, window_bounds = array<i64: 1, 512>}, {transform_indices = @transform_3, window_bounds = array<i64: 128, 512>}, {pipeline_mode = #tpu.pipeline_mode<synchronous>, transform_indices = @transform_4, window_bounds = array<i64: 1, 128>}, {transform_indices = @transform_5, window_bounds = array<i64: 16, 128>}]} {
    %c0_i32 = arith.constant 0 : i32
    %0 = arith.cmpi eq, %arg1, %c0_i32 : i32
    %1 = arith.extui %0 : i1 to i32
    %c0_i32_0 = arith.constant 0 : i32
    %2 = arith.cmpi ne, %1, %c0_i32_0 : i32
    scf.if %2 {
      %cst_15 = arith.constant 0.000000e+00 : f32
      %17 = vector.broadcast %cst_15 : f32 to vector<16x128xf32>
      %c0_16 = arith.constant 0 : index
      %c0_17 = arith.constant 0 : index
      %18 = vector.load %arg8[%c0_16, %c0_17] : memref<16x128xf32, #tpu.memory_space<vmem>>, vector<16x128xf32>
      tpu.vector_store %arg8[%c0_16, %c0_17], %17 {strides = array<i32>} : memref<16x128xf32, #tpu.memory_space<vmem>>, vector<16x128xf32>,
    } else {
    }
    %c0 = arith.constant 0 : index
    %c0_1 = arith.constant 0 : index
    %3 = vector.load %arg2[%c0, %c0_1] : memref<16x128xf32, #tpu.memory_space<vmem>>, vector<16x128xf32>
    %c0_2 = arith.constant 0 : index
    %c0_3 = arith.constant 0 : index
    %4 = vector.load %arg3[%c0_2, %c0_3] : memref<512x128xf32, #tpu.memory_space<vmem>>, vector<512x128xf32>
    %cst = arith.constant dense<0.000000e+00> : vector<16x512xf32>
    %5 = tpu.matmul %3, %4, %cst {dimension_numbers = #tpu.dot_dimension_numbers<[1], [1], [0], [0], [0, 0, 1, 0], [], []>} : vector<16x128xf32>, vector<512x128xf32>, vector<16x512xf32> -> vector<16x512xf32>
    %c0_4 = arith.constant 0 : index
    %c0_5 = arith.constant 0 : index
    %6 = vector.load %arg4[%c0_4, %c0_5] : memref<1x512xf32, #tpu.memory_space<vmem>>, vector<1x512xf32>
    %7 = vector.broadcast %6 : vector<1x512xf32> to vector<16x512xf32>
    %8 = arith.addf %5, %7 : vector<16x512xf32>
    %c0_6 = arith.constant 0 : index
    %c0_7 = arith.constant 0 : index
    %9 = vector.load %arg8[%c0_6, %c0_7] : memref<16x128xf32, #tpu.memory_space<vmem>>, vector<16x128xf32>
    %c0_8 = arith.constant 0 : index
    %c0_9 = arith.constant 0 : index
    %10 = vector.load %arg5[%c0_8, %c0_9] : memref<128x512xf32, #tpu.memory_space<vmem>>, vector<128x512xf32>
    %cst_10 = arith.constant dense<0.000000e+00> : vector<16x128xf32>
    %11 = tpu.matmul %8, %10, %cst_10 {dimension_numbers = #tpu.dot_dimension_numbers<[1], [1], [0], [0], [0, 0, 1, 0], [], []>} : vector<16x512xf32>, vector<128x512xf32>, vector<16x128xf32> -> vector<16x128xf32>
    %12 = arith.addf %9, %11 : vector<16x128xf32>
    %c0_11 = arith.constant 0 : index
    %c0_12 = arith.constant 0 : index
    %13 = vector.load %arg8[%c0_11, %c0_12] : memref<16x128xf32, #tpu.memory_space<vmem>>, vector<16x128xf32>
    tpu.vector_store %arg8[%c0_11, %c0_12], %12 {strides = array<i32>} : memref<16x128xf32, #tpu.memory_space<vmem>>, vector<16x128xf32>,
    %c0_i32_13 = arith.constant 0 : i32
    %14 = arith.cmpi eq, %arg1, %c0_i32_13 : i32
    %15 = arith.extui %14 : i1 to i32
    %c0_i32_14 = arith.constant 0 : i32
    %16 = arith.cmpi ne, %15, %c0_i32_14 : i32
    scf.if %16 {
      %c0_15 = arith.constant 0 : index
      %c0_16 = arith.constant 0 : index
      %17 = vector.load %arg8[%c0_15, %c0_16] : memref<16x128xf32, #tpu.memory_space<vmem>>, vector<16x128xf32>
      %c0_17 = arith.constant 0 : index
      %c0_18 = arith.constant 0 : index
      %18 = vector.load %arg6[%c0_17, %c0_18] : memref<1x128xf32, #tpu.memory_space<vmem>>, vector<1x128xf32>
      %19 = vector.broadcast %18 : vector<1x128xf32> to vector<16x128xf32>
      %20 = arith.addf %17, %19 : vector<16x128xf32>
      %c0_19 = arith.constant 0 : index
      %c0_20 = arith.constant 0 : index
      %21 = vector.load %arg7[%c0_19, %c0_20] : memref<16x128xf32, #tpu.memory_space<vmem>>, vector<16x128xf32>
      tpu.vector_store %arg7[%c0_19, %c0_20], %20 {strides = array<i32>} : memref<16x128xf32, #tpu.memory_space<vmem>>, vector<16x128xf32>,
    } else {
    }
    return
  }
  func.func @transform_0(%arg0: i32, %arg1: i32) -> (i32, i32) {
    %c0_i32 = arith.constant 0 : i32
    %c0_i32_0 = arith.constant 0 : i32
    return %arg0, %c0_i32 : i32, i32
  }
  func.func @transform_1(%arg0: i32, %arg1: i32) -> (i32, i32) {
    %c0_i32 = arith.constant 0 : i32
    %c0_i32_0 = arith.constant 0 : i32
    return %arg1, %c0_i32 : i32, i32
  }
  func.func @transform_2(%arg0: i32, %arg1: i32) -> (i32, i32) {
    %c0_i32 = arith.constant 0 : i32
    %c0_i32_0 = arith.constant 0 : i32
    return %c0_i32, %arg1 : i32, i32
  }
  func.func @transform_3(%arg0: i32, %arg1: i32) -> (i32, i32) {
    %c0_i32 = arith.constant 0 : i32
    %c0_i32_0 = arith.constant 0 : i32
    return %c0_i32, %arg1 : i32, i32
  }
  func.func @transform_4(%arg0: i32, %arg1: i32) -> (i32, i32) {
    %c0_i32 = arith.constant 0 : i32
    %c0_i32_0 = arith.constant 0 : i32
    %c0_i32_1 = arith.constant 0 : i32
    return %c0_i32, %c0_i32_0 : i32, i32
  }
  func.func @transform_5(%arg0: i32, %arg1: i32) -> (i32, i32) {
    %c0_i32 = arith.constant 0 : i32
    %c0_i32_0 = arith.constant 0 : i32
    return %arg0, %c0_i32 : i32, i32
  }
}

</mosaic_0001>

<bundles_post_ra>
// kernel: tpu_custom_call.1
= control target key start
LH: loop header
LB: loop body
LE: loop exit
PB: predicated region body
PF: predicated region fallthrough
CT: control target
= control target key end

     0   :  { %10 = vsyncpa [#allocation4], 0  ;;  %s656_s0 = inlined_call_operand.hbm [shape: f32[16,128], index: 0, kind: input, shape index: {}]   ;;  %s657_s1 = inlined_call_operand.hbm [shape: f32[512,128], index: 1, kind: input, shape index: {}]   ;;  %s658_s2 = inlined_call_operand.hbm [shape: f32[1,512], index: 2, kind: input, shape index: {}]   ;;  %s659_s3 = inlined_call_operand.hbm [shape: f32[128,512], index: 3, kind: input, shape index: {}]   ;;  %s660_s4 = inlined_call_operand.vmem [shape: f32[1,128], index: 4, kind: input, shape index: {}]   ;;  %s661_s5 = inlined_call_operand.hbm [shape: f32[16,128], index: 5, kind: output, shape index: {}]  }
   0x1   :  { %11 = vsyncpa [#allocation7], 0 }
   0x2   :  { %12 = vsyncpa [#allocation10], 0 }
   0x3   :  { %13 = vsyncpa [#allocation5], 0  ;;  %s31_s20 = sshll.u32 %s657_s1, 4  ;;  %s590_s21 = smov [#allocation6]   ;;  %s32_s20 = int_to_ptr.hbm [resolvable:$true] %s31_s20 }
   0x4   :  { %s33_s22 = sshll.u32 %s590_s21, 4  ;;  %s18_s25 = sshll.u32 %s656_s0, 4  ;;  %s34_s22 = int_to_ptr.vmem [resolvable:$true] %s33_s22  ;;  %s19_s25 = int_to_ptr.hbm [resolvable:$true] %s18_s25 }
   0x5   :  { %s591_s26 = smov 128   ;;  %s592_s27 = smov 8  }
   0x6   :  { %39 = dma.hbm_to_vmem [thread:$0]  %s32_s20, 8192, %s34_s22, [#allocation7], %s591_s26, %s591_s26, %s592_s27  }
   0x7   :  { %s593_s28 = smov [#allocation3]   ;;  %s45_s1 = sshll.u32 %s658_s2, 4  ;;  %s46_s1 = int_to_ptr.hbm [resolvable:$true] %s45_s1 }
   0x8   :  { %s20_s29 = sshll.u32 %s593_s28, 4  ;;  %s55_s8 = sshll.u32 %s659_s3, 4  ;;  %s21_s29 = int_to_ptr.vmem [resolvable:$true] %s20_s29  ;;  %s56_s8 = int_to_ptr.hbm [resolvable:$true] %s55_s8 }
   0x9   :  { %26 = dma.hbm_to_vmem [thread:$0]  %s19_s25, 256, %s21_s29, [#allocation4], %s591_s26, %s591_s26, %s592_s27  }
   0xa   :  { %s594_s9 = smov [#allocation8]   ;;  %s595_s11 = smov [#allocation9]  }
   0xb   :  { %s47_s10 = sshll.u32 %s594_s9, 4  ;;  %s57_s12 = sshll.u32 %s595_s11, 4  ;;  %s48_s10 = int_to_ptr.vmem [resolvable:$true] %s47_s10  ;;  %s58_s12 = int_to_ptr.vmem [resolvable:$true] %s57_s12 }
   0xc   :  { %50 = dma.hbm_to_vmem [thread:$0]  %s46_s1, 64, %s48_s10, [#allocation7]  }
   0xd   :  { %s596_s13 = smov 512   ;;  %s597_s2 = smov 32  }
   0xe   :  { %63 = dma.hbm_to_vmem [thread:$0]  %s56_s8, 8192, %s58_s12, [#allocation10], %s596_s13, %s596_s13, %s597_s2  }
   0xf   :  { %582 = dma.done.wait [#allocation4], 256  }
  0x10   :  { %583 = vsyncadd [#allocation4], 4294967040 }
  0x11   :  { %584 = dma.done.wait [#allocation7], 8256  }
  0x12   :  { %585 = vsyncadd [#allocation7], 4294959040 }
  0x13   :  { %586 = dma.done.wait [#allocation10], 8192  }
  0x14   :  { %587 = vsyncadd [#allocation10], 4294959104  ;;  %v137_v0 = vld [vmem:[#allocation6 + $0x178] sm:$0xff]  ;;  %v136_v3 = vld [vmem:[#allocation6 + $0x170] sm:$0xff]  ;;  %s598_s15 = smov [#allocation11]   ;;  %s437_s19 = sshll.u32 %s661_s5, 4  ;;  %s438_s19 = int_to_ptr.hbm [resolvable:$true] %s437_s19 }
  0x15   :  { %v153_v1 = vld [vmem:[#allocation6 + $0x1f8] sm:$0xff]  ;;  %210 = vmatpush.xpose.msra.mxu2 %v137_v0  ;;  %v152_v4 = vld [vmem:[#allocation6 + $0x1f0] sm:$0xff]  ;;  %v135_v8 = vld [vmem:[#allocation6 + $0x168] sm:$0xff]  ;;  %s435_s16 = sshll.u32 %s598_s15, 4  ;;  %s436_s16 = int_to_ptr.vmem [resolvable:$true] %s435_s16 }
  0x16   :  { %233 = vmatpush.xpose.msra.mxu3 %v153_v1  ;;  %v105_v2 = vld [vmem:[#allocation6 + $0x78] sm:$0xff]  ;;  %v104_v6 = vld [vmem:[#allocation6 + $0x70] sm:$0xff]  ;;  %v151_v9 = vld [vmem:[#allocation6 + $0x1e8] sm:$0xff] }
  0x17   :  { %164 = vmatpush.xpose.msra.mxu0 %v105_v2  ;;  %v121_v5 = vld [vmem:[#allocation6 + $0xf8] sm:$0xff]  ;;  %v120_v7 = vld [vmem:[#allocation6 + $0xf0] sm:$0xff]  ;;  %v103_v10 = vld [vmem:[#allocation6 + $0x68] sm:$0xff] }
  0x18   :  { %187 = vmatpush.xpose.msra.mxu1 %v121_v5  ;;  %v119_v11 = vld [vmem:[#allocation6 + $0xe8] sm:$0xff]  ;;  %v134_v12 = vld [vmem:[#allocation6 + $0x160] sm:$0xff]  ;;  %v133_v16 = vld [vmem:[#allocation6 + $0x158] sm:$0xff] }
  0x19   :  { %211 = vmatpush.xpose.msra.mxu2 %v136_v3  ;;  %v150_v13 = vld [vmem:[#allocation6 + $0x1e0] sm:$0xff]  ;;  %v149_v17 = vld [vmem:[#allocation6 + $0x1d8] sm:$0xff]  ;;  %v132_v20 = vld [vmem:[#allocation6 + $0x150] sm:$0xff] }
  0x1a   :  { %234 = vmatpush.xpose.msra.mxu3 %v152_v4  ;;  %v102_v14 = vld [vmem:[#allocation6 + $0x60] sm:$0xff]  ;;  %v101_v18 = vld [vmem:[#allocation6 + $0x58] sm:$0xff]  ;;  %v148_v21 = vld [vmem:[#allocation6 + $0x1d0] sm:$0xff] }
  0x1b   :  { %165 = vmatpush.xpose.msra.mxu0 %v104_v6  ;;  %v118_v15 = vld [vmem:[#allocation6 + $0xe0] sm:$0xff]  ;;  %v117_v19 = vld [vmem:[#allocation6 + $0xd8] sm:$0xff]  ;;  %v100_v22 = vld [vmem:[#allocation6 + $0x50] sm:$0xff] }
  0x1c   :  { %188 = vmatpush.xpose.msra.mxu1 %v120_v7  ;;  %v116_v23 = vld [vmem:[#allocation6 + $0xd0] sm:$0xff]  ;;  %v131_v24 = vld [vmem:[#allocation6 + $0x148] sm:$0xff]  ;;  %v130_v28 = vld [vmem:[#allocation6 + $0x140] sm:$0xff] }
  0x1d   :  { %212 = vmatpush.xpose.msra.mxu2 %v135_v8  ;;  %v147_v25 = vld [vmem:[#allocation6 + $0x1c8] sm:$0xff]  ;;  %v146_v29 = vld [vmem:[#allocation6 + $0x1c0] sm:$0xff]  ;;  %v129_v32 = vld [vmem:[#allocation6 + $0x138] sm:$0xff] }
  0x1e   :  { %235 = vmatpush.xpose.msra.mxu3 %v151_v9  ;;  %v99_v26 = vld [vmem:[#allocation6 + $0x48] sm:$0xff]  ;;  %v98_v30 = vld [vmem:[#allocation6 + $0x40] sm:$0xff]  ;;  %v145_v33 = vld [vmem:[#allocation6 + $0x1b8] sm:$0xff] }
  0x1f   :  { %166 = vmatpush.xpose.msra.mxu0 %v103_v10  ;;  %v115_v27 = vld [vmem:[#allocation6 + $0xc8] sm:$0xff]  ;;  %v114_v31 = vld [vmem:[#allocation6 + $0xc0] sm:$0xff]  ;;  %v97_v34 = vld [vmem:[#allocation6 + $0x38] sm:$0xff] }
  0x20   :  { %189 = vmatpush.xpose.msra.mxu1 %v119_v11  ;;  %v113_v35 = vld [vmem:[#allocation6 + $0xb8] sm:$0xff]  ;;  %v128_v36 = vld [vmem:[#allocation6 + $0x130] sm:$0xff]  ;;  %v127_v40 = vld [vmem:[#allocation6 + $0x128] sm:$0xff] }
  0x21   :  { %213 = vmatpush.xpose.msra.mxu2 %v134_v12  ;;  %v144_v37 = vld [vmem:[#allocation6 + $0x1b0] sm:$0xff]  ;;  %v143_v41 = vld [vmem:[#allocation6 + $0x1a8] sm:$0xff]  ;;  %v126_v44 = vld [vmem:[#allocation6 + $0x120] sm:$0xff] }
  0x22   :  { %236 = vmatpush.xpose.msra.mxu3 %v150_v13  ;;  %v96_v38 = vld [vmem:[#allocation6 + $0x30] sm:$0xff]  ;;  %v95_v42 = vld [vmem:[#allocation6 + $0x28] sm:$0xff]  ;;  %v142_v45 = vld [vmem:[#allocation6 + $0x1a0] sm:$0xff] }
  0x23   :  { %167 = vmatpush.xpose.msra.mxu0 %v102_v14  ;;  %v112_v39 = vld [vmem:[#allocation6 + $0xb0] sm:$0xff]  ;;  %v111_v43 = vld [vmem:[#allocation6 + $0xa8] sm:$0xff]  ;;  %v94_v46 = vld [vmem:[#allocation6 + $0x20] sm:$0xff] }
  0x24   :  { %190 = vmatpush.xpose.msra.mxu1 %v118_v15  ;;  %v110_v47 = vld [vmem:[#allocation6 + $0xa0] sm:$0xff]  ;;  %v125_v48 = vld [vmem:[#allocation6 + $0x118] sm:$0xff]  ;;  %v124_v52 = vld [vmem:[#allocation6 + $0x110] sm:$0xff] }
  0x25   :  { %214 = vmatpush.xpose.msra.mxu2 %v133_v16  ;;  %v141_v49 = vld [vmem:[#allocation6 + $0x198] sm:$0xff]  ;;  %v140_v53 = vld [vmem:[#allocation6 + $0x190] sm:$0xff]  ;;  %v123_v56 = vld [vmem:[#allocation6 + $0x108] sm:$0xff] }
  0x26   :  { %237 = vmatpush.xpose.msra.mxu3 %v149_v17  ;;  %v93_v50 = vld [vmem:[#allocation6 + $0x18] sm:$0xff]  ;;  %v92_v54 = vld [vmem:[#allocation6 + $0x10] sm:$0xff]  ;;  %v139_v57 = vld [vmem:[#allocation6 + $0x188] sm:$0xff] }
  0x27   :  { %168 = vmatpush.xpose.msra.mxu0 %v101_v18  ;;  %v109_v51 = vld [vmem:[#allocation6 + $0x98] sm:$0xff]  ;;  %v108_v55 = vld [vmem:[#allocation6 + $0x90] sm:$0xff]  ;;  %v91_v58 = vld [vmem:[#allocation6 + $0x8] sm:$0xff] }
  0x28   :  { %191 = vmatpush.xpose.msra.mxu1 %v117_v19  ;;  %v107_v59 = vld [vmem:[#allocation6 + $0x88] sm:$0xff]  ;;  %v122_v60 = vld [vmem:[#allocation6 + $0x100] sm:$0xff]  ;;  %v320_v63 = vld [vmem:[#allocation9 + $0x1f0] sm:$0xff] }
  0x29   :  { %215 = vmatpush.xpose.msra.mxu2 %v132_v20  ;;  %v138_v61 = vld [vmem:[#allocation6 + $0x180] sm:$0xff]  ;;  %v88_v2 = vld [vmem:[#allocation3] sm:$0xff]  ;;  %v89_v11 = vld [vmem:[#allocation3 + $0x8] sm:$0xff] }
  0x2a   :  { %238 = vmatpush.xpose.msra.mxu3 %v148_v21  ;;  %v90_v62 = vld [vmem:[#allocation6] sm:$0xff]  ;;  %v319_v3 = vld [vmem:[#allocation9 + $0x1e8] sm:$0xff]  ;;  %v316_v5 = vld [vmem:[#allocation9 + $0x1d0] sm:$0xff] }
  0x2b   :  { %169 = vmatpush.xpose.msra.mxu0 %v100_v22  ;;  %v106_v0 = vld [vmem:[#allocation6 + $0x80] sm:$0xff]  ;;  %v315_v7 = vld [vmem:[#allocation9 + $0x1c8] sm:$0xff]  ;;  %v312_v9 = vld [vmem:[#allocation9 + $0x1b0] sm:$0xff] }
  0x2c   :  { %192 = vmatpush.xpose.msra.mxu1 %v116_v23  ;;  %v321_v1 = vld [vmem:[#allocation9 + $0x1f8] sm:$0xff]  ;;  %v318_v4 = vld [vmem:[#allocation9 + $0x1e0] sm:$0xff]  ;;  %v311_v12 = vld [vmem:[#allocation9 + $0x1a8] sm:$0xff] }
  0x2d   :  { %216 = vmatpush.xpose.msra.mxu2 %v131_v24  ;;  %v317_v6 = vld [vmem:[#allocation9 + $0x1d8] sm:$0xff]  ;;  %v314_v8 = vld [vmem:[#allocation9 + $0x1c0] sm:$0xff]  ;;  %v308_v14 = vld [vmem:[#allocation9 + $0x190] sm:$0xff] }
  0x2e   :  { %239 = vmatpush.xpose.msra.mxu3 %v147_v25  ;;  %v313_v10 = vld [vmem:[#allocation9 + $0x1b8] sm:$0xff]  ;;  %v310_v13 = vld [vmem:[#allocation9 + $0x1a0] sm:$0xff]  ;;  %v307_v16 = vld [vmem:[#allocation9 + $0x188] sm:$0xff] }
  0x2f   :  { %170 = vmatpush.xpose.msra.mxu0 %v99_v26  ;;  %v309_v15 = vld [vmem:[#allocation9 + $0x198] sm:$0xff]  ;;  %v306_v17 = vld [vmem:[#allocation9 + $0x180] sm:$0xff]  ;;  %v304_v18 = vld [vmem:[#allocation9 + $0x170] sm:$0xff] }
  0x30   :  { %193 = vmatpush.xpose.msra.mxu1 %v115_v27  ;;  %v305_v19 = vld [vmem:[#allocation9 + $0x178] sm:$0xff]  ;;  %v303_v20 = vld [vmem:[#allocation9 + $0x168] sm:$0xff]  ;;  %v302_v21 = vld [vmem:[#allocation9 + $0x160] sm:$0xff] }
  0x31   :  { %217 = vmatpush.xpose.msra.mxu2 %v130_v28  ;;  %v300_v22 = vld [vmem:[#allocation9 + $0x150] sm:$0xff]  ;;  %v301_v23 = vld [vmem:[#allocation9 + $0x158] sm:$0xff]  ;;  %v299_v24 = vld [vmem:[#allocation9 + $0x148] sm:$0xff] }
  0x32   :  { %240 = vmatpush.xpose.msra.mxu3 %v146_v29  ;;  %v298_v25 = vld [vmem:[#allocation9 + $0x140] sm:$0xff]  ;;  %v296_v26 = vld [vmem:[#allocation9 + $0x130] sm:$0xff]  ;;  %v297_v27 = vld [vmem:[#allocation9 + $0x138] sm:$0xff] }
  0x33   :  { %171 = vmatpush.xpose.msra.mxu0 %v98_v30  ;;  %v295_v28 = vld [vmem:[#allocation9 + $0x128] sm:$0xff]  ;;  %v294_v29 = vld [vmem:[#allocation9 + $0x120] sm:$0xff]  ;;  %v292_v30 = vld [vmem:[#allocation9 + $0x110] sm:$0xff] }
  0x34   :  { %194 = vmatpush.xpose.msra.mxu1 %v114_v31  ;;  %v293_v31 = vld [vmem:[#allocation9 + $0x118] sm:$0xff] }
  0x35   :  { %218 = vmatpush.xpose.msra.mxu2 %v129_v32  ;;  %v291_v32 = vld [vmem:[#allocation9 + $0x108] sm:$0xff] }
  0x36   :  { %241 = vmatpush.xpose.msra.mxu3 %v145_v33  ;;  %v290_v33 = vld [vmem:[#allocation9 + $0x100] sm:$0xff] }
  0x37   :  { %172 = vmatpush.xpose.msra.mxu0 %v97_v34  ;;  %v288_v34 = vld [vmem:[#allocation9 + $0xf0] sm:$0xff] }
  0x38   :  { %195 = vmatpush.xpose.msra.mxu1 %v113_v35  ;;  %v289_v35 = vld [vmem:[#allocation9 + $0xf8] sm:$0xff] }
  0x39   :  { %219 = vmatpush.xpose.msra.mxu2 %v128_v36  ;;  %v287_v36 = vld [vmem:[#allocation9 + $0xe8] sm:$0xff] }
  0x3a   :  { %242 = vmatpush.xpose.msra.mxu3 %v144_v37  ;;  %v286_v37 = vld [vmem:[#allocation9 + $0xe0] sm:$0xff] }
  0x3b   :  { %173 = vmatpush.xpose.msra.mxu0 %v96_v38  ;;  %v284_v38 = vld [vmem:[#allocation9 + $0xd0] sm:$0xff] }
  0x3c   :  { %196 = vmatpush.xpose.msra.mxu1 %v112_v39  ;;  %v285_v39 = vld [vmem:[#allocation9 + $0xd8] sm:$0xff] }
  0x3d   :  { %220 = vmatpush.xpose.msra.mxu2 %v127_v40  ;;  %v283_v40 = vld [vmem:[#allocation9 + $0xc8] sm:$0xff] }
  0x3e   :  { %243 = vmatpush.xpose.msra.mxu3 %v143_v41  ;;  %v282_v41 = vld [vmem:[#allocation9 + $0xc0] sm:$0xff] }
  0x3f   :  { %174 = vmatpush.xpose.msra.mxu0 %v95_v42  ;;  %v280_v42 = vld [vmem:[#allocation9 + $0xb0] sm:$0xff] }
  0x40   :  { %197 = vmatpush.xpose.msra.mxu1 %v111_v43  ;;  %v281_v43 = vld [vmem:[#allocation9 + $0xb8] sm:$0xff] }
  0x41   :  { %221 = vmatpush.xpose.msra.mxu2 %v126_v44  ;;  %v279_v44 = vld [vmem:[#allocation9 + $0xa8] sm:$0xff] }
  0x42   :  { %244 = vmatpush.xpose.msra.mxu3 %v142_v45  ;;  %v278_v45 = vld [vmem:[#allocation9 + $0xa0] sm:$0xff] }
  0x43   :  { %175 = vmatpush.xpose.msra.mxu0 %v94_v46  ;;  %v276_v46 = vld [vmem:[#allocation9 + $0x90] sm:$0xff] }
  0x44   :  { %198 = vmatpush.xpose.msra.mxu1 %v110_v47  ;;  %v277_v47 = vld [vmem:[#allocation9 + $0x98] sm:$0xff] }
  0x45   :  { %222 = vmatpush.xpose.msra.mxu2 %v125_v48  ;;  %v275_v48 = vld [vmem:[#allocation9 + $0x88] sm:$0xff] }
  0x46   :  { %245 = vmatpush.xpose.msra.mxu3 %v141_v49  ;;  %v274_v49 = vld [vmem:[#allocation9 + $0x80] sm:$0xff] }
  0x47   :  { %176 = vmatpush.xpose.msra.mxu0 %v93_v50  ;;  %v272_v50 = vld [vmem:[#allocation9 + $0x70] sm:$0xff] }
  0x48   :  { %199 = vmatpush.xpose.msra.mxu1 %v109_v51  ;;  %v273_v51 = vld [vmem:[#allocation9 + $0x78] sm:$0xff] }
  0x49   :  { %223 = vmatpush.xpose.msra.mxu2 %v124_v52  ;;  %v271_v52 = vld [vmem:[#allocation9 + $0x68] sm:$0xff] }
  0x4a   :  { %246 = vmatpush.xpose.msra.mxu3 %v140_v53  ;;  %v270_v53 = vld [vmem:[#allocation9 + $0x60] sm:$0xff] }
  0x4b   :  { %177 = vmatpush.xpose.msra.mxu0 %v92_v54  ;;  %v268_v54 = vld [vmem:[#allocation9 + $0x50] sm:$0xff] }
  0x4c   :  { %200 = vmatpush.xpose.msra.mxu1 %v108_v55  ;;  %v269_v55 = vld [vmem:[#allocation9 + $0x58] sm:$0xff] }
  0x4d   :  { %224 = vmatpush.xpose.msra.mxu2 %v123_v56  ;;  %v267_v56 = vld [vmem:[#allocation9 + $0x48] sm:$0xff] }
  0x4e   :  { %247 = vmatpush.xpose.msra.mxu3 %v139_v57  ;;  %v266_v57 = vld [vmem:[#allocation9 + $0x40] sm:$0xff] }
  0x4f   :  { %178 = vmatpush.xpose.msra.mxu0 %v91_v58  ;;  %v264_v58 = vld [vmem:[#allocation9 + $0x30] sm:$0xff] }
  0x50   :  { %201 = vmatpush.xpose.msra.mxu1 %v107_v59  ;;  %v265_v59 = vld [vmem:[#allocation9 + $0x38] sm:$0xff] }
  0x51   :  { %225 = vmatpush.xpose.msra.mxu2 %v122_v60  ;;  %v262_v60 = vld [vmem:[#allocation9 + $0x20] sm:$0xff] }
  0x52   :  { %248 = vmatpush.xpose.msra.mxu3 %v138_v61  ;;  %v263_v61 = vld [vmem:[#allocation9 + $0x28] sm:$0xff] }
  0x53   :  { %179 = vmatpush.xpose.msra.mxu0 %v90_v62  ;;  %v260_v62 = vld [vmem:[#allocation9 + $0x10] sm:$0xff] }
  0x54   :  { %202 = vmatpush.xpose.msra.mxu1 %v106_v0  ;;  %226 = vmatmul.f32.vlgmr.msra.gmra.mxu2 %v88_v2  ;;  %v258_v0 = vld [vmem:[#allocation9] sm:$0xff] }
  0x55   :  { %368 = vmatpush.xpose.msrb.mxu2 %v320_v63  ;;  %249 = vmatmul.f32.vlgmr.msra.gmra.mxu3 %v88_v2  ;;  %v261_v63 = vld [vmem:[#allocation9 + $0x18] sm:$0xff] }
  0x56   :  { %391 = vmatpush.xpose.msrb.mxu3 %v321_v1  ;;  %180 = vmatmul.f32.vlgmr.msra.gmra.mxu0 %v88_v2  ;;  %v259_v1 = vld [vmem:[#allocation9 + $0x8] sm:$0xff] }
  0x57   :  { %203 = vmatmul.f32.vlgmr.msra.gmra.mxu1 %v88_v2  ;;  %322 = vmatpush.xpose.msrb.mxu0 %v318_v4  ;;  %v154_v2 = vld [vmem:[#allocation8] sm:$0xf] }
  0x58   :  { %345 = vmatpush.xpose.msrb.mxu1 %v319_v3  ;;  %v156_v3 = vperm.slane %v154_v2, 0  ;;  %v157_v4 = vperm.slane %v154_v2, 1 }
  0x59   :  { %369 = vmatpush.xpose.msrb.mxu2 %v316_v5 }
  0x5a   :  { %392 = vmatpush.xpose.msrb.mxu3 %v317_v6 }
  0x5b   :  { %323 = vmatpush.xpose.msrb.mxu0 %v314_v8  ;;  %v158_v8 = vperm.slane %v154_v2, 2 }
  0x5c   :  { %346 = vmatpush.xpose.msrb.mxu1 %v315_v7  ;;  %229 = vmatmul.f32.gmra.mxu2 %v89_v11 }
  0x5d   :  { %370 = vmatpush.xpose.msrb.mxu2 %v312_v9  ;;  %252 = vmatmul.f32.gmra.mxu3 %v89_v11  ;;  %v159_v9 = vperm.slane %v154_v2, 3 }
  0x5e   :  { %393 = vmatpush.xpose.msrb.mxu3 %v313_v10  ;;  %183 = vmatmul.f32.gmra.mxu0 %v89_v11 }
  0x5f   :  { %206 = vmatmul.f32.gmra.mxu1 %v89_v11  ;;  %324 = vmatpush.xpose.msrb.mxu0 %v310_v13 }
  0x60   :  { %347 = vmatpush.xpose.msrb.mxu1 %v311_v12 }
  0x61   :  { %371 = vmatpush.xpose.msrb.mxu2 %v308_v14 }
  0x62   :  { %394 = vmatpush.xpose.msrb.mxu3 %v309_v15 }
  0x63   :  { %325 = vmatpush.xpose.msrb.mxu0 %v306_v17 }
  0x64   :  { %348 = vmatpush.xpose.msrb.mxu1 %v307_v16 }
  0x65   :  { %372 = vmatpush.xpose.msrb.mxu2 %v304_v18 }
  0x66   :  { %395 = vmatpush.xpose.msrb.mxu3 %v305_v19 }
  0x67   :  { %326 = vmatpush.xpose.msrb.mxu0 %v302_v21 }
  0x68   :  { %349 = vmatpush.xpose.msrb.mxu1 %v303_v20 }
  0x69   :  { %373 = vmatpush.xpose.msrb.mxu2 %v300_v22 }
  0x6a   :  { %396 = vmatpush.xpose.msrb.mxu3 %v301_v23 }
  0x6b   :  { %327 = vmatpush.xpose.msrb.mxu0 %v298_v25 }
  0x6c   :  { %350 = vmatpush.xpose.msrb.mxu1 %v299_v24 }
  0x6d   :  { %374 = vmatpush.xpose.msrb.mxu2 %v296_v26 }
  0x6e   :  { %397 = vmatpush.xpose.msrb.mxu3 %v297_v27 }
  0x6f   :  { %328 = vmatpush.xpose.msrb.mxu0 %v294_v29  ;;  %v461_v29 = vld [vmem:[%s660_s4] ss:$0 sm:$0xff] }
  0x70   :  { %351 = vmatpush.xpose.msrb.mxu1 %v295_v28 }
  0x71   :  { %375 = vmatpush.xpose.msrb.mxu2 %v292_v30 }
  0x72   :  { %398 = vmatpush.xpose.msrb.mxu3 %v293_v31 }
  0x73   :  { %329 = vmatpush.xpose.msrb.mxu0 %v290_v33 }
  0x74   :  { %352 = vmatpush.xpose.msrb.mxu1 %v291_v32 }
  0x75   :  { %376 = vmatpush.xpose.msrb.mxu2 %v288_v34 }
  0x76   :  { %399 = vmatpush.xpose.msrb.mxu3 %v289_v35 }
  0x77   :  { %330 = vmatpush.xpose.msrb.mxu0 %v286_v37 }
  0x78   :  { %353 = vmatpush.xpose.msrb.mxu1 %v287_v36 }
  0x79   :  { %377 = vmatpush.xpose.msrb.mxu2 %v284_v38 }
  0x7a   :  { %400 = vmatpush.xpose.msrb.mxu3 %v285_v39 }
  0x7b   :  { %331 = vmatpush.xpose.msrb.mxu0 %v282_v41 }
  0x7c   :  { %354 = vmatpush.xpose.msrb.mxu1 %v283_v40 }
  0x7d   :  { %378 = vmatpush.xpose.msrb.mxu2 %v280_v42 }
  0x7e   :  { %401 = vmatpush.xpose.msrb.mxu3 %v281_v43 }
  0x7f   :  { %332 = vmatpush.xpose.msrb.mxu0 %v278_v45 }
  0x80   :  { %355 = vmatpush.xpose.msrb.mxu1 %v279_v44 }
  0x81   :  { %379 = vmatpush.xpose.msrb.mxu2 %v276_v46 }
  0x82   :  { %402 = vmatpush.xpose.msrb.mxu3 %v277_v47 }
  0x83   :  { %333 = vmatpush.xpose.msrb.mxu0 %v274_v49 }
  0x84   :  { %356 = vmatpush.xpose.msrb.mxu1 %v275_v48 }
  0x85   :  { %380 = vmatpush.xpose.msrb.mxu2 %v272_v50 }
  0x86   :  { %403 = vmatpush.xpose.msrb.mxu3 %v273_v51 }
  0x87   :  { %334 = vmatpush.xpose.msrb.mxu0 %v270_v53 }
  0x88   :  { %357 = vmatpush.xpose.msrb.mxu1 %v271_v52 }
  0x89   :  { %381 = vmatpush.xpose.msrb.mxu2 %v268_v54 }
  0x8a   :  { %404 = vmatpush.xpose.msrb.mxu3 %v269_v55 }
  0x8b   :  { %335 = vmatpush.xpose.msrb.mxu0 %v266_v57 }
  0x8c   :  { %358 = vmatpush.xpose.msrb.mxu1 %v267_v56 }
  0x8d   :  { %382 = vmatpush.xpose.msrb.mxu2 %v264_v58 }
  0x8e   :  { %405 = vmatpush.xpose.msrb.mxu3 %v265_v59 }
  0x8f   :  { %336 = vmatpush.xpose.msrb.mxu0 %v262_v60 }
  0x90   :  { %359 = vmatpush.xpose.msrb.mxu1 %v263_v61 }
  0x91   :  { %383 = vmatpush.xpose.msrb.mxu2 %v260_v62 }
  0x92   :  { %406 = vmatpush.xpose.msrb.mxu3 %v261_v63 }
  0x93   :  { %337 = vmatpush.xpose.msrb.mxu0 %v258_v0 }
  0x94   :  { %360 = vmatpush.xpose.msrb.mxu1 %v259_v1 }
  0xd3   :  { %v181_v5 = vpop.f32.mrf.mxu0 }
  0xd4   :  { %v182_v6 = vadd.f32 %v181_v5, %v156_v3  ;;  %v204_v7 = vpop.f32.mrf.mxu1 }
  0xd5   :  { %v205_v10 = vadd.f32 %v204_v7, %v157_v4 }
  0xd6   :  { %338 = vmatmul.f32.vlgmr.msrb.gmra.mxu0 %v182_v6 }
  0xd7   :  { %361 = vmatmul.f32.vlgmr.msrb.gmra.mxu1 %v205_v10  ;;  %v227_v11 = vpop.f32.mrf.mxu2 }
  0xd8   :  { %v250_v12 = vpop.f32.mrf.mxu3  ;;  %v228_v13 = vadd.f32 %v227_v11, %v158_v8 }
  0xd9   :  { %v251_v14 = vadd.f32 %v250_v12, %v159_v9 }
  0xda   :  { %384 = vmatmul.f32.vlgmr.msrb.gmra.mxu2 %v228_v13 }
  0xdb   :  { %407 = vmatmul.f32.vlgmr.msrb.gmra.mxu3 %v251_v14  ;;  %v184_v15 = vpop.f32.mrf.mxu0 }
  0xdc   :  { %v185_v16 = vadd.f32 %v184_v15, %v156_v3  ;;  %v207_v17 = vpop.f32.mrf.mxu1 }
  0xdd   :  { %v208_v18 = vadd.f32 %v207_v17, %v157_v4 }
  0xde   :  { %341 = vmatmul.f32.gmra.mxu0 %v185_v16 }
  0xdf   :  { %364 = vmatmul.f32.gmra.mxu1 %v208_v18  ;;  %v230_v19 = vpop.f32.mrf.mxu2 }
  0xe0   :  { %v253_v20 = vpop.f32.mrf.mxu3  ;;  %v231_v21 = vadd.f32 %v230_v19, %v158_v8 }
  0xe1   :  { %v254_v22 = vadd.f32 %v253_v20, %v159_v9 }
  0xe2   :  { %387 = vmatmul.f32.gmra.mxu2 %v231_v21 }
  0xe3   :  { %410 = vmatmul.f32.gmra.mxu3 %v254_v22 }
 0x153   :  { %v339_v23 = vpop.f32.mrf.mxu0 }
 0x154   :  { %v362_v24 = vpop.f32.mrf.mxu1 }
 0x155   :  { %v363_v25 = vadd.f32 %v362_v24, %v339_v23 }
 0x15b   :  { %v342_v30 = vpop.f32.mrf.mxu0 }
 0x15c   :  { %v365_v31 = vpop.f32.mrf.mxu1 }
 0x15d   :  { %v385_v26 = vpop.f32.mrf.mxu2  ;;  %v366_v34 = vadd.f32 %v365_v31, %v342_v30 }
 0x15e   :  { %v408_v27 = vpop.f32.mrf.mxu3  ;;  %v386_v28 = vadd.f32 %v385_v26, %v363_v25 }
 0x160   :  { %v409_v32 = vadd.f32 %v408_v27, %v386_v28 }
 0x162   :  { %v427_v33 = vadd.f32 %v461_v29, %v409_v32 }
 0x164   :  { %429 = vst [vmem:[#allocation11] sm:$0xff] %v427_v33 }
 0x165   :  { %v388_v35 = vpop.f32.mrf.mxu2 }
 0x166   :  { %v411_v36 = vpop.f32.mrf.mxu3  ;;  %v389_v37 = vadd.f32 %v388_v35, %v366_v34 }
 0x168   :  { %v412_v38 = vadd.f32 %v411_v36, %v389_v37 }
 0x16a   :  { %v428_v39 = vadd.f32 %v461_v29, %v412_v38 }
 0x16c   :  { %430 = vst [vmem:[#allocation11 + $0x8] sm:$0xff] %v428_v39 }
 0x16d   :  { %443 = dma.vmem_to_hbm [thread:$0]  %s436_s16, 256, %s438_s19, [#allocation5], %s591_s26, %s591_s26, %s592_s27  }
 0x16e   :  { %588 = dma.done.wait [#allocation5], 256  }
 0x16f   :  { %589 = vsyncadd [#allocation5], 4294967040 }
 0x170   :  { %448 = vsyncpa [#allocation4], 1 }
 0x171   :  { %449 = vsyncpa [#allocation7], 1 }
 0x172   :  { %450 = vsyncpa [#allocation10], 1 }
 0x173   :  { %451 = vsyncpa [#allocation5], 1 }

</bundles_post_ra>
